<compile_context>
chip_gen: v7x
topology: tpu7x:2x2x1
jax: 0.10.0
libtpu: 0.0.40
codegen_flags: <defaults>
</compile_context>

<pallas_src>
import jax
import jax.numpy as jnp
from jax.experimental import pallas as pl
from jax.experimental.pallas import tpu as pltpu


def _fused_matvec_kernel(x_ref, w_ref, b_ref, o_ref):
    # x_ref: (nb, C, hw_tile) input slab (NCHW: channels on sublanes, pixels on lanes)
    # w_ref: (1, C)           fused weight row (same block every step -> resident)
    # b_ref: (1,)             fused bias scalar in SMEM
    # o_ref: (nb, 1, hw_tile) lane-dense output slab
    nb = x_ref.shape[0]
    b = b_ref[0]
    # Static tiny unroll over the (folded) batch: each dot stays a clean
    # (1,C)@(C,hw) MXU call with an unmasked lane-dense (1, hw) store; avoids
    # any transpose/relayout a rank-3 einsum could introduce in lowering.
    for i in range(nb):
        y = jnp.dot(w_ref[...], x_ref[i], preferred_element_type=jnp.float32)
        o_ref[i] = (y + b).astype(o_ref.dtype)


def model_forward(x_nchw, params, *, hw_tile=None):
    (w1, b1), (w2, b2), (w3, b3), (w4, b4) = params
    N, C, H, W = x_nchw.shape
    assert C == w1.shape[0]
    HW = H * W
    Cout = w4.shape[1]
    itemsize = x_nchw.dtype.itemsize

    # --- fuse the 4 affine layers once, at full precision (one-time, tiny) ---
    hp = jax.lax.Precision.HIGHEST
    w_eff = jnp.dot(jnp.dot(jnp.dot(w1, w2, precision=hp), w3, precision=hp),
                    w4, precision=hp)                                  # (C, 1)
    b_eff = (jnp.dot(jnp.dot(jnp.dot(b1, w2, precision=hp) + b2,
                             w3, precision=hp) + b3,
                     w4, precision=hp) + b4)                           # (1,)
    w_row = w_eff.T                                                    # (1, C)
    # NOTE: x could be cast to bf16 here to halve HBM read traffic on large HW;
    # kept f32 because the 1e-4 tolerance vs the unfused reference is tight.

    # --- NCHW kept as-is; metadata-only reshape to (N, C, H*W) ---
    x3d = x_nchw.reshape(N, C, HW)

    # --- pixel tile: lane-aligned, floor 512 px (>=2 KiB strided-DMA rows),
    # default 4096 px (2 MiB f32 block) to amortize per-grid-step overhead;
    # double-buffered this stays inside v5e's 16 MiB scoped-VMEM default. ---
    if hw_tile is None:
        hw_tile = 4096
    hw_tile = min(hw_tile, HW)
    if hw_tile != HW:
        floor = 512 if HW >= 512 else 128
        hw_tile = max(floor, (hw_tile // 128) * 128)
        hw_tile = min(hw_tile, HW)

    # --- fold the whole batch into one grid step when the input is tiny
    # (removes the fixed per-step cost, which dominates at ~256 KiB total);
    # otherwise keep grid=(N, HW tiles) with both axes parallel (v7x megacore). ---
    if hw_tile == HW and N * C * HW * itemsize <= 2 * 1024 * 1024 and N <= 8:
        nb = N
    else:
        nb = 1
    grid = (N // nb, pl.cdiv(HW, hw_tile))

    cost = pl.CostEstimate(
        flops=2 * N * C * HW,
        transcendentals=0,
        bytes_accessed=N * C * HW * itemsize + N * Cout * HW * itemsize + C * 4 + 4,
    )

    out3d = pl.pallas_call(
        _fused_matvec_kernel,
        out_shape=jax.ShapeDtypeStruct((N, Cout, HW), x_nchw.dtype),
        grid_spec=pltpu.PrefetchScalarGridSpec(
            num_scalar_prefetch=0,
            grid=grid,
            in_specs=[
                pl.BlockSpec((nb, C, hw_tile), lambda n, j: (n, 0, j)),  # x slab
                pl.BlockSpec((1, C), lambda n, j: (0, 0)),               # fused W
                pl.BlockSpec(memory_space=pltpu.MemorySpace.SMEM),       # fused b
            ],
            out_specs=pl.BlockSpec((nb, Cout, hw_tile), lambda n, j: (n, 0, j)),
        ),
        compiler_params=pltpu.CompilerParams(
            dimension_semantics=("parallel", "parallel")),
        cost_estimate=cost,
    )(x3d, w_row, b_eff)

    # (N, 1, H*W) -> (N, 1, H, W): metadata-only reshape
    return out3d.reshape(N, Cout, H, W)


def init_params(key):
    # ConvTranspose2d(Cin, Cout, 1): weight (Cin, Cout, 1, 1) kept as (Cin, Cout)
    # since y[:, co] = sum_ci x[:, ci] * w[ci, co] + b[co].
    dims = [(128, 64), (64, 32), (32, 4), (4, 1)]
    params = []
    for (cin, cout) in dims:
        key, kw, kb = jax.random.split(key, 3)
        bound = 1.0 / (cin ** 0.5)
        w = jax.random.uniform(kw, (cin, cout), jnp.float32, -bound, bound)
        b = jax.random.uniform(kb, (cout,), jnp.float32, -bound, bound)
        params.append((w, b))
    return params


def _reference(x_nchw, params):
    # Pure-JAX reference of the original (unfused) chained 1x1 conv-transpose.
    x = jnp.transpose(x_nchw, (0, 2, 3, 1))
    for (w, b) in params:
        x = jnp.einsum('nhwc,cd->nhwd', x, w, precision='highest') + b
    return jnp.transpose(x, (0, 3, 1, 2))


if __name__ == "__main__":
    key = jax.random.PRNGKey(0)
    key, kx = jax.random.split(key)
    # small shape consistent with the module: N=2, C=128, H=W=16
    x = jax.random.normal(kx, (2, 128, 16, 16), jnp.float32)
    params = init_params(key)

    out = model_forward(x, params)
    jax.block_until_ready(out)

    ref = _reference(x, params)
    assert out.shape == (2, 1, 16, 16), out.shape
    assert jnp.allclose(out, ref, atol=1e-4, rtol=1e-4), "mismatch vs reference"
    print("KERNEL_OK")
</pallas_src>

<mosaic_0001>
module attributes {stable_mosaic.version = 11 : i64} {
  func.func @_fused_matvec_kernel(%arg0: i32, %arg1: i32, %arg2: memref<2x128x256xf32, #tpu.memory_space<vmem>>, %arg3: memref<1x128xf32, #tpu.memory_space<vmem>>, %arg4: memref<1xf32, #tpu.memory_space<smem>>, %arg5: memref<2x1x256xf32, #tpu.memory_space<vmem>>) attributes {dimension_semantics = [#tpu.dimension_semantics<parallel>, #tpu.dimension_semantics<parallel>], iteration_bounds = array<i64: 1, 1>, scalar_prefetch = 0 : i64, scratch_operands = 0 : i64, tpu.core_type = #tpu.core_type<tc>, window_params = [{transform_indices = @transform_0, window_bounds = array<i64: 2, 128, 256>}, {pipeline_mode = #tpu.pipeline_mode<synchronous>, transform_indices = @transform_1, window_bounds = array<i64: 1, 128>}, {transform_indices = @transform_2, window_bounds = array<i64: 1>}, {transform_indices = @transform_3, window_bounds = array<i64: 2, 1, 256>}]} {
    %c0 = arith.constant 0 : index
    %0 = memref.load %arg4[%c0] : memref<1xf32, #tpu.memory_space<smem>>
    %c0_0 = arith.constant 0 : index
    %c0_1 = arith.constant 0 : index
    %1 = vector.load %arg3[%c0_0, %c0_1] : memref<1x128xf32, #tpu.memory_space<vmem>>, vector<1x128xf32>
    %c0_2 = arith.constant 0 : index
    %c0_3 = arith.constant 0 : index
    %c0_4 = arith.constant 0 : index
    %2 = vector.load %arg2[%c0_2, %c0_3, %c0_4] : memref<2x128x256xf32, #tpu.memory_space<vmem>>, vector<1x128x256xf32>
    %3 = vector.shape_cast %2 : vector<1x128x256xf32> to vector<128x256xf32>
    %cst = arith.constant dense<0.000000e+00> : vector<1x256xf32>
    %4 = tpu.matmul %1, %3, %cst {dimension_numbers = #tpu.dot_dimension_numbers<[1], [0], [0], [1], [0, 0, 1, 1], [], []>} : vector<1x128xf32>, vector<128x256xf32>, vector<1x256xf32> -> vector<1x256xf32>
    %5 = vector.broadcast %0 : f32 to vector<1x256xf32>
    %6 = arith.addf %4, %5 : vector<1x256xf32>
    %c0_5 = arith.constant 0 : index
    %c0_6 = arith.constant 0 : index
    %c0_7 = arith.constant 0 : index
    %7 = vector.load %arg5[%c0_5, %c0_6, %c0_7] : memref<2x1x256xf32, #tpu.memory_space<vmem>>, vector<1x1x256xf32>
    %8 = vector.shape_cast %7 : vector<1x1x256xf32> to vector<1x256xf32>
    %9 = vector.shape_cast %6 : vector<1x256xf32> to vector<1x1x256xf32>
    tpu.vector_store %arg5[%c0_5, %c0_6, %c0_7], %9 {strides = array<i32>} : memref<2x1x256xf32, #tpu.memory_space<vmem>>, vector<1x1x256xf32>,
    %c0_8 = arith.constant 0 : index
    %c0_9 = arith.constant 0 : index
    %10 = vector.load %arg3[%c0_8, %c0_9] : memref<1x128xf32, #tpu.memory_space<vmem>>, vector<1x128xf32>
    %c1 = arith.constant 1 : index
    %c0_10 = arith.constant 0 : index
    %c0_11 = arith.constant 0 : index
    %11 = vector.load %arg2[%c1, %c0_10, %c0_11] : memref<2x128x256xf32, #tpu.memory_space<vmem>>, vector<1x128x256xf32>
    %12 = vector.shape_cast %11 : vector<1x128x256xf32> to vector<128x256xf32>
    %cst_12 = arith.constant dense<0.000000e+00> : vector<1x256xf32>
    %13 = tpu.matmul %10, %12, %cst_12 {dimension_numbers = #tpu.dot_dimension_numbers<[1], [0], [0], [1], [0, 0, 1, 1], [], []>} : vector<1x128xf32>, vector<128x256xf32>, vector<1x256xf32> -> vector<1x256xf32>
    %14 = vector.broadcast %0 : f32 to vector<1x256xf32>
    %15 = arith.addf %13, %14 : vector<1x256xf32>
    %c1_13 = arith.constant 1 : index
    %c0_14 = arith.constant 0 : index
    %c0_15 = arith.constant 0 : index
    %16 = vector.load %arg5[%c1_13, %c0_14, %c0_15] : memref<2x1x256xf32, #tpu.memory_space<vmem>>, vector<1x1x256xf32>
    %17 = vector.shape_cast %16 : vector<1x1x256xf32> to vector<1x256xf32>
    %18 = vector.shape_cast %15 : vector<1x256xf32> to vector<1x1x256xf32>
    tpu.vector_store %arg5[%c1_13, %c0_14, %c0_15], %18 {strides = array<i32>} : memref<2x1x256xf32, #tpu.memory_space<vmem>>, vector<1x1x256xf32>,
    return
  }
  func.func @transform_0(%arg0: i32, %arg1: i32) -> (i32, i32, i32) {
    %c0_i32 = arith.constant 0 : i32
    %c0_i32_0 = arith.constant 0 : i32
    return %arg0, %c0_i32, %arg1 : i32, i32, i32
  }
  func.func @transform_1(%arg0: i32, %arg1: i32) -> (i32, i32) {
    %c0_i32 = arith.constant 0 : i32
    %c0_i32_0 = arith.constant 0 : i32
    %c0_i32_1 = arith.constant 0 : i32
    return %c0_i32, %c0_i32_0 : i32, i32
  }
  func.func @transform_2(%arg0: i32, %arg1: i32) -> i32 {
    %c0_i32 = arith.constant 0 : i32
    %c0_i32_0 = arith.constant 0 : i32
    return %c0_i32 : i32
  }
  func.func @transform_3(%arg0: i32, %arg1: i32) -> (i32, i32, i32) {
    %c0_i32 = arith.constant 0 : i32
    %c0_i32_0 = arith.constant 0 : i32
    return %arg0, %c0_i32, %arg1 : i32, i32, i32
  }
}

</mosaic_0001>

<bundles_post_ra>
// kernel: tpu_custom_call.1
= control target key start
LH: loop header
LB: loop body
LE: loop exit
PB: predicated region body
PF: predicated region fallthrough
CT: control target
= control target key end

     0   :  { %9 = vsyncpa [#allocation4], 0  ;;  %s482_s0 = inlined_call_operand.hbm [shape: f32[2,128,256], index: 0, kind: input, shape index: {}]   ;;  %s483_s1 = inlined_call_operand.vmem [shape: f32[1,128], index: 1, kind: input, shape index: {}]   ;;  %s484_s2 = inlined_call_operand.<no memory space> [shape: f32[1], index: 2, kind: input, shape index: {}]   ;;  %s485_s3 = inlined_call_operand.hbm [shape: f32[2,1,256], index: 3, kind: output, shape index: {}]  }
   0x1   :  { %10 = vsyncpa [#allocation5], 0  ;;  %s421_s12 = smov [#allocation3]   ;;  %s373_s16 = scalar_lea.hbm %s482_s0, 8192 }
   0x2   :  { %s16_s13 = sshll.u32 %s421_s12, 4  ;;  %p374_p0 = scmp.ne.s32.totalorder %s482_s0, %s373_s16  ;;  %s17_s13 = int_to_ptr.vmem [resolvable:$true] %s16_s13 }
   0x3   :  { %p377_p1 = scmp.lt.u32.totalorder %s373_s16, %s482_s0 }
   0x5   :  { %p379_p2 = pnand %p377_p1, %p374_p0 }
   0x7   :  { %382 = shalt.err (!%p379_p2)
}
   0x8   :  { %s383_s21 = scalar_lea.vmem %s17_s13, 8192  ;;  %p388_p4 = scmp.lt.s32.totalorder %s17_s13, %s17_s13 }
   0x9   :  { %p384_p3 = scmp.ne.s32.totalorder %s17_s13, %s383_s21  ;;  %p389_p5 = scmp.lt.s32.totalorder %s383_s21, %s383_s21 }
   0xb   :  { %p390_p6 = por %p389_p5, %p388_p4 }
   0xd   :  { %p391_p7 = pnand %p390_p6, %p384_p3 }
   0xf   :  { %394 = shalt.err (!%p391_p7)
}
  0x10   :  { %s422_s22 = smov 256   ;;  %s423_s23 = smov 16  }
  0x11   :  { %22 = dma.hbm_to_vmem [thread:$0]  %s482_s0, 8192, %s17_s13, [#allocation4], %s422_s22, %s422_s22, %s423_s23  }
  0x12   :  { %417 = dma.done.wait [#allocation4], 8192  }
  0x13   :  { %418 = vsyncadd [#allocation4], 4294959104  ;;  %v424_v0 = vmov 0.0   ;;  %v33_v1 = vld [vmem:[#allocation3 + $0x8] sm:$0xff]  ;;  %v35_v2 = vld [vmem:[#allocation3 + $0x18] sm:$0xff] }
  0x14   :  { %129 = vmatprep.mubr.f32.mxu0 %v424_v0  ;;  %257 = vmatprep.mubr.f32.mxu1 %v424_v0  ;;  %v162_v3 = vld [vmem:[#allocation3 + $0x108] sm:$0xff]  ;;  %v301_v4 = vpack.c.bf16 %v35_v2, %v33_v1  ;;  %v164_v5 = vld [vmem:[#allocation3 + $0x118] sm:$0xff]  ;;  %v32_v6 = vld [vmem:[#allocation3] sm:$0xff] }
  0x15   :  { %v34_v7 = vld [vmem:[#allocation3 + $0x10] sm:$0xff]  ;;  %v333_v8 = vpack.c.bf16 %v164_v5, %v162_v3  ;;  %v161_v10 = vld [vmem:[#allocation3 + $0x100] sm:$0xff]  ;;  %v37_v12 = vld [vmem:[#allocation3 + $0x28] sm:$0xff] }
  0x16   :  { %v303_v9 = vpack.c.bf16 %v34_v7, %v32_v6  ;;  %v163_v11 = vld [vmem:[#allocation3 + $0x110] sm:$0xff]  ;;  %302 = vmatprep.subr.bf16.mxu0 %v301_v4  ;;  %v39_v14 = vld [vmem:[#allocation3 + $0x38] sm:$0xff]  ;;  %v166_v15 = vld [vmem:[#allocation3 + $0x128] sm:$0xff] }
  0x17   :  { %v335_v13 = vpack.c.bf16 %v163_v11, %v161_v10  ;;  %v168_v16 = vld [vmem:[#allocation3 + $0x138] sm:$0xff]  ;;  %334 = vmatprep.subr.bf16.mxu1 %v333_v8  ;;  %v305_v17 = vpack.c.bf16 %v39_v14, %v37_v12  ;;  %v36_v19 = vld [vmem:[#allocation3 + $0x20] sm:$0xff]  ;;  %v38_v20 = vld [vmem:[#allocation3 + $0x30] sm:$0xff] }
  0x18   :  { %304 = vmatpush1.bf16.msra.mxu0 %v303_v9  ;;  %v337_v18 = vpack.c.bf16 %v168_v16, %v166_v15  ;;  %v165_v21 = vld [vmem:[#allocation3 + $0x120] sm:$0xff]  ;;  %v307_v22 = vpack.c.bf16 %v38_v20, %v36_v19  ;;  %v167_v23 = vld [vmem:[#allocation3 + $0x130] sm:$0xff]  ;;  %v41_v24 = vld [vmem:[#allocation3 + $0x48] sm:$0xff] }
  0x19   :  { %336 = vmatpush1.bf16.msra.mxu1 %v335_v13  ;;  %v43_v25 = vld [vmem:[#allocation3 + $0x58] sm:$0xff]  ;;  %306 = vmatprep.subr.bf16.mxu0 %v305_v17  ;;  %v339_v26 = vpack.c.bf16 %v167_v23, %v165_v21  ;;  %v170_v28 = vld [vmem:[#allocation3 + $0x148] sm:$0xff]  ;;  %v40_v30 = vld [vmem:[#allocation3 + $0x40] sm:$0xff] }
  0x1a   :  { %338 = vmatprep.subr.bf16.mxu1 %v337_v18  ;;  %v309_v27 = vpack.c.bf16 %v43_v25, %v41_v24  ;;  %v172_v29 = vld [vmem:[#allocation3 + $0x158] sm:$0xff]  ;;  %v42_v32 = vld [vmem:[#allocation3 + $0x50] sm:$0xff]  ;;  %v169_v33 = vld [vmem:[#allocation3 + $0x140] sm:$0xff] }
  0x1b   :  { %v341_v31 = vpack.c.bf16 %v172_v29, %v170_v28  ;;  %v171_v34 = vld [vmem:[#allocation3 + $0x150] sm:$0xff]  ;;  %v311_v35 = vpack.c.bf16 %v42_v32, %v40_v30  ;;  %v45_v36 = vld [vmem:[#allocation3 + $0x68] sm:$0xff]  ;;  %v47_v37 = vld [vmem:[#allocation3 + $0x78] sm:$0xff] }
  0x1c   :  { %308 = vmatpush1.bf16.msra.mxu0 %v307_v22  ;;  %v174_v38 = vld [vmem:[#allocation3 + $0x168] sm:$0xff]  ;;  %v343_v39 = vpack.c.bf16 %v171_v34, %v169_v33  ;;  %v313_v40 = vpack.c.bf16 %v47_v37, %v45_v36  ;;  %v176_v41 = vld [vmem:[#allocation3 + $0x178] sm:$0xff]  ;;  %v44_v42 = vld [vmem:[#allocation3 + $0x60] sm:$0xff]  ;;  %v142_v37 = vlaneseq }
  0x1d   :  { %340 = vmatpush1.bf16.msra.mxu1 %v339_v26  ;;  %310 = vmatprep.subr.bf16.mxu0 %v309_v27  ;;  %v46_v43 = vld [vmem:[#allocation3 + $0x70] sm:$0xff]  ;;  %v345_v44 = vpack.c.bf16 %v176_v41, %v174_v38  ;;  %v173_v45 = vld [vmem:[#allocation3 + $0x160] sm:$0xff]  ;;  %v49_v47 = vld [vmem:[#allocation3 + $0x88] sm:$0xff]  ;;  %v64_v38 = vstv %s484_s2 }
  0x1e   :  { %342 = vmatprep.subr.bf16.mxu1 %v341_v31  ;;  %v175_v46 = vld [vmem:[#allocation3 + $0x170] sm:$0xff]  ;;  %v51_v48 = vld [vmem:[#allocation3 + $0x98] sm:$0xff]  ;;  %v178_v49 = vld [vmem:[#allocation3 + $0x188] sm:$0xff]  ;;  %v315_v51 = vpack.c.bf16 %v46_v43, %v44_v42  ;;  %vm156_vm0 = vcmp.lt.s32.totalorder %v142_v37, 256 }
  0x1f   :  { %v180_v50 = vld [vmem:[#allocation3 + $0x198] sm:$0xff]  ;;  %v347_v52 = vpack.c.bf16 %v175_v46, %v173_v45  ;;  %v317_v53 = vpack.c.bf16 %v51_v48, %v49_v47  ;;  %v48_v54 = vld [vmem:[#allocation3 + $0x80] sm:$0xff]  ;;  %v50_v55 = vld [vmem:[#allocation3 + $0x90] sm:$0xff] }
  0x20   :  { %312 = vmatpush1.bf16.msra.mxu0 %v311_v35  ;;  %v177_v56 = vld [vmem:[#allocation3 + $0x180] sm:$0xff]  ;;  %v349_v57 = vpack.c.bf16 %v180_v50, %v178_v49  ;;  %v179_v58 = vld [vmem:[#allocation3 + $0x190] sm:$0xff]  ;;  %v53_v59 = vld [vmem:[#allocation3 + $0xa8] sm:$0xff]  ;;  %v319_v63 = vpack.c.bf16 %v50_v55, %v48_v54  ;;  %v425_v35 = vmov 1966171168  }
  0x21   :  { %344 = vmatpush1.bf16.msra.mxu1 %v343_v39  ;;  %314 = vmatprep.subr.bf16.mxu0 %v313_v40  ;;  %v55_v60 = vld [vmem:[#allocation3 + $0xb8] sm:$0xff]  ;;  %v182_v61 = vld [vmem:[#allocation3 + $0x1a8] sm:$0xff]  ;;  %v351_v0 = vpack.c.bf16 %v179_v58, %v177_v56  ;;  %v52_v2 = vld [vmem:[#allocation3 + $0xa0] sm:$0xff]  ;;  %v140_v36 = vunpack.c.l.s4 %v425_v35  ;;  %v143_v40 = vshrl.u32 %v142_v37, 7 }
  0x22   :  { %346 = vmatprep.subr.bf16.mxu1 %v345_v44  ;;  %v184_v62 = vld [vmem:[#allocation3 + $0x1b8] sm:$0xff]  ;;  %v321_v1 = vpack.c.bf16 %v55_v60, %v53_v59  ;;  %v54_v3 = vld [vmem:[#allocation3 + $0xb0] sm:$0xff]  ;;  %v181_v4 = vld [vmem:[#allocation3 + $0x1a0] sm:$0xff] }
  0x23   :  { %v353_v5 = vpack.c.bf16 %v184_v62, %v182_v61  ;;  %v183_v6 = vld [vmem:[#allocation3 + $0x1b0] sm:$0xff]  ;;  %v57_v7 = vld [vmem:[#allocation3 + $0xc8] sm:$0xff]  ;;  %v59_v8 = vld [vmem:[#allocation3 + $0xd8] sm:$0xff]  ;;  %v323_v11 = vpack.c.bf16 %v54_v3, %v52_v2  ;;  %v141_v39 = vunpack.c.0.s8 %v140_v36 }
  0x24   :  { %316 = vmatpush1.bf16.msra.mxu0 %v315_v51  ;;  %v186_v9 = vld [vmem:[#allocation3 + $0x1c8] sm:$0xff]  ;;  %v188_v10 = vld [vmem:[#allocation3 + $0x1d8] sm:$0xff]  ;;  %v355_v12 = vpack.c.bf16 %v183_v6, %v181_v4  ;;  %v325_v13 = vpack.c.bf16 %v59_v8, %v57_v7  ;;  %v56_v14 = vld [vmem:[#allocation3 + $0xc0] sm:$0xff] }
  0x25   :  { %348 = vmatpush1.bf16.msra.mxu1 %v347_v52  ;;  %318 = vmatprep.subr.bf16.mxu0 %v317_v53  ;;  %v58_v15 = vld [vmem:[#allocation3 + $0xd0] sm:$0xff]  ;;  %v185_v16 = vld [vmem:[#allocation3 + $0x1c0] sm:$0xff]  ;;  %v357_v17 = vpack.c.bf16 %v188_v10, %v186_v9  ;;  %v61_v19 = vld [vmem:[#allocation3 + $0xe8] sm:$0xff]  ;;  %v144_v47 = vsub.s32 %v141_v39, %v143_v40 }
  0x26   :  { %350 = vmatprep.subr.bf16.mxu1 %v349_v57  ;;  %v187_v18 = vld [vmem:[#allocation3 + $0x1d0] sm:$0xff]  ;;  %v63_v20 = vld [vmem:[#allocation3 + $0xf8] sm:$0xff]  ;;  %v190_v21 = vld [vmem:[#allocation3 + $0x1e8] sm:$0xff]  ;;  %v327_v23 = vpack.c.bf16 %v58_v15, %v56_v14 }
  0x27   :  { %v192_v22 = vld [vmem:[#allocation3 + $0x1f8] sm:$0xff]  ;;  %v359_v24 = vpack.c.bf16 %v187_v18, %v185_v16  ;;  %v329_v25 = vpack.c.bf16 %v63_v20, %v61_v19  ;;  %v60_v26 = vld [vmem:[#allocation3 + $0xe0] sm:$0xff]  ;;  %v62_v27 = vld [vmem:[#allocation3 + $0xf0] sm:$0xff] }
  0x28   :  { %320 = vmatpush1.bf16.msra.mxu0 %v319_v63  ;;  %v361_v28 = vpack.c.bf16 %v192_v22, %v190_v21  ;;  %v189_v29 = vld [vmem:[#allocation3 + $0x1e0] sm:$0xff]  ;;  %v191_v30 = vld [vmem:[#allocation3 + $0x1f0] sm:$0xff]  ;;  %v331_v31 = vpack.c.bf16 %v62_v27, %v60_v26 }
  0x29   :  { %352 = vmatpush1.bf16.msra.mxu1 %v351_v0  ;;  %322 = vmatprep.subr.bf16.mxu0 %v321_v1  ;;  %v363_v32 = vpack.c.bf16 %v191_v30, %v189_v29  ;;  %v31_v33 = vld [vmem:[%s483_s1] sm:$0x1] }
  0x2a   :  { %354 = vmatprep.subr.bf16.mxu1 %v353_v5  ;;  %v159_v34 = vld [vmem:[%s483_s1] sm:$0x1]  ;;  %s426_s1 = smov [#allocation6]  }
  0x2b   :  { %s289_s4 = sshll.u32 %s426_s1, 4  ;;  %s290_s4 = int_to_ptr.vmem [resolvable:$true] %s289_s4 }
  0x2c   :  { %324 = vmatpush1.bf16.msra.mxu0 %v323_v11  ;;  %s395_s2 = scalar_lea.vmem %s290_s4, 64  ;;  %p400_p9 = scmp.lt.s32.totalorder %s290_s4, %s290_s4 }
  0x2d   :  { %356 = vmatpush1.bf16.msra.mxu1 %v355_v12  ;;  %326 = vmatprep.subr.bf16.mxu0 %v325_v13  ;;  %p396_p8 = scmp.ne.s32.totalorder %s290_s4, %s395_s2  ;;  %p401_p10 = scmp.lt.s32.totalorder %s395_s2, %s395_s2 }
  0x2e   :  { %358 = vmatprep.subr.bf16.mxu1 %v357_v17 }
  0x2f   :  { %p402_p11 = por %p401_p10, %p400_p9 }
  0x30   :  { %328 = vmatpush1.bf16.msra.mxu0 %v327_v23 }
  0x31   :  { %360 = vmatpush1.bf16.msra.mxu1 %v359_v24  ;;  %330 = vmatprep.subr.bf16.mxu0 %v329_v25  ;;  %p403_p12 = pnand %p402_p11, %p396_p8 }
  0x32   :  { %362 = vmatprep.subr.bf16.mxu1 %v361_v28 }
  0x34   :  { %332 = vmatpush1.bf16.msra.mxu0 %v331_v31 }
  0x35   :  { %364 = vmatpush1.bf16.msra.mxu1 %v363_v32 }
  0x37   :  { %130 = vmatmul.mubr.f32.vlgmr.msra.gmra.mrb[0].mxu0 %v31_v33 }
  0x38   :  { %258 = vmatmul.mubr.f32.vlgmr.msra.gmra.mrb[0].mxu1 %v159_v34 }
 0x10a   :  { %v131_v41 = vpop.f32.mrb[0].mxu0 }
 0x10b   :  { %v132_v42 = vadd.f32 %v131_v41, %v64_v38  ;;  %v259_v43 = vpop.f32.mrb[0].mxu1  ;;  %v133_v44 = vpop.f32.mrb[1].mxu0 }
 0x10c   :  { %v260_v45 = vadd.f32 %v259_v43, %v64_v38  ;;  %v134_v46 = vadd.f32 %v133_v44, %v64_v38  ;;  %v261_v48 = vpop.f32.mrb[1].mxu1 }
 0x10d   :  { %v262_v49 = vadd.f32 %v261_v48, %v64_v38 }
 0x10e   :  { %v138_v50 = vcombine.low %v132_v42, %v134_v46 }
 0x10f   :  { %v266_v51 = vcombine.low %v260_v45, %v262_v49 }
 0x110   :  { %v145_v52 = vrot.slane %v138_v50, %v144_v47 }
 0x111   :  { %v273_v53 = vrot.slane %v266_v51, %v144_v47 }
 0x112   :  { %v152_v54 = vrot.slane %v145_v52, %v144_v47 }
 0x113   :  { %v280_v55 = vrot.slane %v273_v53, %v144_v47 }
 0x114   :  { %158 = vst.msk [vmem:[#allocation6] sm:$0x3] %vm156_vm0, %v152_v54 }
 0x115   :  { %283 = vst.msk [vmem:[#allocation6 + $0x2] sm:$0x3] %vm156_vm0, %v280_v55 }
 0x116   :  { %406 = shalt.err (!%p403_p12)
}
 0x117   :  { %s407_s7 = scalar_lea.hbm %s485_s3, 64 }
 0x118   :  { %p408_p13 = scmp.ne.s32.totalorder %s485_s3, %s407_s7  ;;  %p411_p0 = scmp.lt.u32.totalorder %s407_s7, %s485_s3 }
 0x11a   :  { %p413_p1 = pnand %p411_p0, %p408_p13 }
 0x11c   :  { %416 = shalt.err (!%p413_p1)
}
 0x11d   :  { %s427_s12 = smov 32   ;;  %s428_s13 = smov 2  }
 0x11e   :  { %295 = dma.vmem_to_hbm [thread:$0]  %s290_s4, 64, %s485_s3, [#allocation5], %s427_s12, %s427_s12, %s428_s13  }
 0x11f   :  { %419 = dma.done.wait [#allocation5], 64  }
 0x120   :  { %420 = vsyncadd [#allocation5], 4294967232 }
 0x121   :  { %299 = vsyncpa [#allocation4], 1 }
 0x122   :  { %300 = vsyncpa [#allocation5], 1 }

</bundles_post_ra>
